<compile_context>
chip_gen: v6e
topology: v6e:2x2x1
jax: 0.10.0
libtpu: 0.0.40
codegen_flags: <defaults>
</compile_context>

<pallas_src>
import jax
import jax.numpy as jnp
from jax.experimental import pallas as pl
from jax.experimental.pallas import tpu as pltpu

HIDDEN = 64                # logical hidden size (nn.Linear(.., 64))
HIDDEN_PAD = 128           # lane-dense padded hidden size (also matches v5e MXU width)
TILE_B_MAX = 8192          # upper bound on batch tile
VMEM_LIMIT_BYTES = 32 << 20   # explicit scoped-VMEM limit (safe on v5e/v6e/v7x)
VMEM_TILE_BUDGET = 20 << 20   # target live set used when sizing the batch tile


def _round_up(n, m):
    return (n + m - 1) // m * m


def _mlp_kernel(x_ref, w1_ref, b1_ref, w2_ref, b2_ref, w3_ref, b3_ref, o_ref):
    # One batch tile: fused matmul -> bias -> ReLU x2 -> matmul -> bias, all f32 on the MXU.
    x = x_ref[...]                                                      # (tile_b, in_dim) f32
    h = jnp.dot(x, w1_ref[...], preferred_element_type=jnp.float32)    # (tile_b, 128)
    h = jnp.maximum(h + b1_ref[...], 0.0)
    h = jnp.dot(h, w2_ref[...], preferred_element_type=jnp.float32)    # (tile_b, 128)
    h = jnp.maximum(h + b2_ref[...], 0.0)
    o_ref[...] = jnp.dot(h, w3_ref[...], preferred_element_type=jnp.float32) + b3_ref[...]


def prepare_params(params):
    """One-time weight prep: pad hidden 64 -> 128 (lane-dense, zero rows/cols are inert
    through bias/ReLU), keep the output feature dim narrow so the kernel writes exactly
    [B, out_dim].  Call once, reuse across forward calls."""
    w1, b1 = params["w1"], params["b1"]
    w2, b2 = params["w2"], params["b2"]
    w3, b3 = params["w3"], params["b3"]
    in_dim = w1.shape[0]
    out_dim = w3.shape[1]
    w1p = jnp.zeros((in_dim, HIDDEN_PAD), jnp.float32).at[:, :HIDDEN].set(w1)
    b1p = jnp.zeros((1, HIDDEN_PAD), jnp.float32).at[:, :HIDDEN].set(b1)
    w2p = jnp.zeros((HIDDEN_PAD, HIDDEN_PAD), jnp.float32).at[:HIDDEN, :HIDDEN].set(w2)
    b2p = jnp.zeros((1, HIDDEN_PAD), jnp.float32).at[:, :HIDDEN].set(b2)
    w3p = jnp.zeros((HIDDEN_PAD, out_dim), jnp.float32).at[:HIDDEN, :].set(w3)
    b3p = jnp.asarray(b3, jnp.float32).reshape(1, out_dim)
    return {"w1": w1p, "b1": b1p, "w2": w2p, "b2": b2p, "w3": w3p, "b3": b3p}


def _choose_tile_b(batch, in_dim, out_dim):
    """VMEM-budgeted batch tile.  x/out are double-buffered by Pallas; the two 128-wide f32
    intermediates dominate.  For large batches force >= 2 tiles so the 'parallel' grid axis
    can feed both v7x TensorCores."""
    bytes_per_row = 4 * (2 * in_dim + 2 * out_dim + 2 * HIDDEN_PAD)
    cap = int(max(512, min(TILE_B_MAX, VMEM_TILE_BUDGET // bytes_per_row)))
    if batch <= 1024 and batch <= cap:
        return batch                               # single full-extent tile (always legal)
    n_tiles = max(2, -(-batch // cap))             # ceil; >= 2 tiles for megacore
    return max(8, _round_up(-(-batch // n_tiles), 8))


@jax.jit
def forward_model(x, prepared):
    """x: [B, input_dim] float32.  prepared: output of prepare_params().
    Returns [B, output_dim] float32."""
    w1p, b1p = prepared["w1"], prepared["b1"]
    w2p, b2p = prepared["w2"], prepared["b2"]
    w3p, b3p = prepared["w3"], prepared["b3"]

    batch, in_dim = x.shape
    out_dim = w3p.shape[1]

    x = x.astype(jnp.float32)
    tile_b = _choose_tile_b(batch, in_dim, out_dim)
    n_tiles = pl.cdiv(batch, tile_b)

    const_map = lambda i: (0, 0)   # weights/biases: fetched once, VMEM-resident across tiles

    flops = 2 * batch * (in_dim * HIDDEN_PAD + HIDDEN_PAD * HIDDEN_PAD + HIDDEN_PAD * out_dim)
    bytes_accessed = (
        x.size * 4 + batch * out_dim * 4
        + (w1p.size + w2p.size + w3p.size + b1p.size + b2p.size + b3p.size) * 4
    )

    return pl.pallas_call(
        _mlp_kernel,
        out_shape=jax.ShapeDtypeStruct((batch, out_dim), jnp.float32),
        grid=(n_tiles,),
        in_specs=[
            pl.BlockSpec((tile_b, in_dim), lambda i: (i, 0)),
            pl.BlockSpec(w1p.shape, const_map),
            pl.BlockSpec(b1p.shape, const_map),
            pl.BlockSpec(w2p.shape, const_map),
            pl.BlockSpec(b2p.shape, const_map),
            pl.BlockSpec(w3p.shape, const_map),
            pl.BlockSpec(b3p.shape, const_map),
        ],
        out_specs=pl.BlockSpec((tile_b, out_dim), lambda i: (i, 0)),
        compiler_params=pltpu.CompilerParams(
            dimension_semantics=("parallel",),
            vmem_limit_bytes=VMEM_LIMIT_BYTES,
        ),
        cost_estimate=pl.CostEstimate(
            flops=flops, transcendentals=0, bytes_accessed=bytes_accessed
        ),
    )(x, w1p, b1p, w2p, b2p, w3p, b3p)


def init_params(key, input_dim, output_dim):
    """Deterministic init mimicking nn.Linear's uniform(-1/sqrt(fan_in), 1/sqrt(fan_in))."""
    ks = jax.random.split(key, 6)

    def linear(kw, kb, fan_in, fan_out):
        bound = 1.0 / jnp.sqrt(float(fan_in))
        # Stored as [in, out] (transpose of torch's [out, in]) so the kernel does x @ W.
        w = jax.random.uniform(kw, (fan_in, fan_out), jnp.float32, -bound, bound)
        b = jax.random.uniform(kb, (1, fan_out), jnp.float32, -bound, bound)
        return w, b

    w1, b1 = linear(ks[0], ks[1], input_dim, HIDDEN)
    w2, b2 = linear(ks[2], ks[3], HIDDEN, HIDDEN)
    w3, b3 = linear(ks[4], ks[5], HIDDEN, output_dim)
    return {"w1": w1, "b1": b1, "w2": w2, "b2": b2, "w3": w3, "b3": b3}


def forward_model_ref(x, p):
    h = jnp.maximum(x @ p["w1"] + p["b1"], 0.0)
    h = jnp.maximum(h @ p["w2"] + p["b2"], 0.0)
    return h @ p["w3"] + p["b3"]


if __name__ == "__main__":
    key = jax.random.PRNGKey(0)
    k_x, k_p, k_x2 = jax.random.split(key, 3)

    batch, input_dim, output_dim = 8, 16, 4
    params = init_params(k_p, input_dim, output_dim)
    prepared = prepare_params(params)

    # Small single-tile case.
    x = jax.random.normal(k_x, (batch, input_dim), jnp.float32)
    out = jax.block_until_ready(forward_model(x, prepared))
    ref = forward_model_ref(x, params)
    assert out.shape == (batch, output_dim), out.shape
    assert jnp.allclose(out, ref, atol=2e-2, rtol=2e-2), float(jnp.max(jnp.abs(out - ref)))

    # Multi-tile case (2 batch tiles on the "parallel" grid axis).
    batch2 = 1040
    x2 = jax.random.normal(k_x2, (batch2, input_dim), jnp.float32)
    out2 = jax.block_until_ready(forward_model(x2, prepared))
    ref2 = forward_model_ref(x2, params)
    assert out2.shape == (batch2, output_dim), out2.shape
    assert jnp.allclose(out2, ref2, atol=2e-2, rtol=2e-2), float(jnp.max(jnp.abs(out2 - ref2)))

    print("KERNEL_OK")
</pallas_src>

<mosaic_0001>
module attributes {stable_mosaic.version = 11 : i64} {
  func.func @_mlp_kernel(%arg0: i32, %arg1: memref<8x16xf32, #tpu.memory_space<vmem>>, %arg2: memref<16x128xf32, #tpu.memory_space<vmem>>, %arg3: memref<1x128xf32, #tpu.memory_space<vmem>>, %arg4: memref<128x128xf32, #tpu.memory_space<vmem>>, %arg5: memref<1x128xf32, #tpu.memory_space<vmem>>, %arg6: memref<128x4xf32, #tpu.memory_space<vmem>>, %arg7: memref<1x4xf32, #tpu.memory_space<vmem>>, %arg8: memref<8x4xf32, #tpu.memory_space<vmem>>) attributes {dimension_semantics = [#tpu.dimension_semantics<parallel>], iteration_bounds = array<i64: 1>, scalar_prefetch = 0 : i64, scratch_operands = 0 : i64, tpu.core_type = #tpu.core_type<tc>, window_params = [{transform_indices = @transform_0, window_bounds = array<i64: 8, 16>}, {pipeline_mode = #tpu.pipeline_mode<synchronous>, transform_indices = @transform_1, window_bounds = array<i64: 16, 128>}, {pipeline_mode = #tpu.pipeline_mode<synchronous>, transform_indices = @transform_2, window_bounds = array<i64: 1, 128>}, {pipeline_mode = #tpu.pipeline_mode<synchronous>, transform_indices = @transform_3, window_bounds = array<i64: 128, 128>}, {pipeline_mode = #tpu.pipeline_mode<synchronous>, transform_indices = @transform_4, window_bounds = array<i64: 1, 128>}, {pipeline_mode = #tpu.pipeline_mode<synchronous>, transform_indices = @transform_5, window_bounds = array<i64: 128, 4>}, {pipeline_mode = #tpu.pipeline_mode<synchronous>, transform_indices = @transform_6, window_bounds = array<i64: 1, 4>}, {transform_indices = @transform_7, window_bounds = array<i64: 8, 4>}]} {
    %c0 = arith.constant 0 : index
    %c0_0 = arith.constant 0 : index
    %0 = vector.load %arg1[%c0, %c0_0] : memref<8x16xf32, #tpu.memory_space<vmem>>, vector<8x16xf32>
    %c0_1 = arith.constant 0 : index
    %c0_2 = arith.constant 0 : index
    %1 = vector.load %arg2[%c0_1, %c0_2] : memref<16x128xf32, #tpu.memory_space<vmem>>, vector<16x128xf32>
    %cst = arith.constant dense<0.000000e+00> : vector<8x128xf32>
    %2 = tpu.matmul %0, %1, %cst {dimension_numbers = #tpu.dot_dimension_numbers<[1], [0], [0], [1], [0, 0, 1, 1], [], []>} : vector<8x16xf32>, vector<16x128xf32>, vector<8x128xf32> -> vector<8x128xf32>
    %c0_3 = arith.constant 0 : index
    %c0_4 = arith.constant 0 : index
    %3 = vector.load %arg3[%c0_3, %c0_4] : memref<1x128xf32, #tpu.memory_space<vmem>>, vector<1x128xf32>
    %4 = vector.broadcast %3 : vector<1x128xf32> to vector<8x128xf32>
    %5 = arith.addf %2, %4 : vector<8x128xf32>
    %cst_5 = arith.constant 0.000000e+00 : f32
    %6 = vector.broadcast %cst_5 : f32 to vector<8x128xf32>
    %7 = arith.maximumf %5, %6 : vector<8x128xf32>
    %c0_6 = arith.constant 0 : index
    %c0_7 = arith.constant 0 : index
    %8 = vector.load %arg4[%c0_6, %c0_7] : memref<128x128xf32, #tpu.memory_space<vmem>>, vector<128x128xf32>
    %cst_8 = arith.constant dense<0.000000e+00> : vector<8x128xf32>
    %9 = tpu.matmul %7, %8, %cst_8 {dimension_numbers = #tpu.dot_dimension_numbers<[1], [0], [0], [1], [0, 0, 1, 1], [], []>} : vector<8x128xf32>, vector<128x128xf32>, vector<8x128xf32> -> vector<8x128xf32>
    %c0_9 = arith.constant 0 : index
    %c0_10 = arith.constant 0 : index
    %10 = vector.load %arg5[%c0_9, %c0_10] : memref<1x128xf32, #tpu.memory_space<vmem>>, vector<1x128xf32>
    %11 = vector.broadcast %10 : vector<1x128xf32> to vector<8x128xf32>
    %12 = arith.addf %9, %11 : vector<8x128xf32>
    %cst_11 = arith.constant 0.000000e+00 : f32
    %13 = vector.broadcast %cst_11 : f32 to vector<8x128xf32>
    %14 = arith.maximumf %12, %13 : vector<8x128xf32>
    %c0_12 = arith.constant 0 : index
    %c0_13 = arith.constant 0 : index
    %15 = vector.load %arg6[%c0_12, %c0_13] : memref<128x4xf32, #tpu.memory_space<vmem>>, vector<128x4xf32>
    %cst_14 = arith.constant dense<0.000000e+00> : vector<8x4xf32>
    %16 = tpu.matmul %14, %15, %cst_14 {dimension_numbers = #tpu.dot_dimension_numbers<[1], [0], [0], [1], [0, 0, 1, 1], [], []>} : vector<8x128xf32>, vector<128x4xf32>, vector<8x4xf32> -> vector<8x4xf32>
    %c0_15 = arith.constant 0 : index
    %c0_16 = arith.constant 0 : index
    %17 = vector.load %arg7[%c0_15, %c0_16] : memref<1x4xf32, #tpu.memory_space<vmem>>, vector<1x4xf32>
    %18 = vector.broadcast %17 : vector<1x4xf32> to vector<8x4xf32>
    %19 = arith.addf %16, %18 : vector<8x4xf32>
    %c0_17 = arith.constant 0 : index
    %c0_18 = arith.constant 0 : index
    %20 = vector.load %arg8[%c0_17, %c0_18] : memref<8x4xf32, #tpu.memory_space<vmem>>, vector<8x4xf32>
    tpu.vector_store %arg8[%c0_17, %c0_18], %19 {strides = array<i32>} : memref<8x4xf32, #tpu.memory_space<vmem>>, vector<8x4xf32>,
    return
  }
  func.func @transform_0(%arg0: i32) -> (i32, i32) {
    %c0_i32 = arith.constant 0 : i32
    %c0_i32_0 = arith.constant 0 : i32
    return %arg0, %c0_i32 : i32, i32
  }
  func.func @transform_1(%arg0: i32) -> (i32, i32) {
    %c0_i32 = arith.constant 0 : i32
    %c0_i32_0 = arith.constant 0 : i32
    %c0_i32_1 = arith.constant 0 : i32
    return %c0_i32, %c0_i32_0 : i32, i32
  }
  func.func @transform_2(%arg0: i32) -> (i32, i32) {
    %c0_i32 = arith.constant 0 : i32
    %c0_i32_0 = arith.constant 0 : i32
    %c0_i32_1 = arith.constant 0 : i32
    return %c0_i32, %c0_i32_0 : i32, i32
  }
  func.func @transform_3(%arg0: i32) -> (i32, i32) {
    %c0_i32 = arith.constant 0 : i32
    %c0_i32_0 = arith.constant 0 : i32
    %c0_i32_1 = arith.constant 0 : i32
    return %c0_i32, %c0_i32_0 : i32, i32
  }
  func.func @transform_4(%arg0: i32) -> (i32, i32) {
    %c0_i32 = arith.constant 0 : i32
    %c0_i32_0 = arith.constant 0 : i32
    %c0_i32_1 = arith.constant 0 : i32
    return %c0_i32, %c0_i32_0 : i32, i32
  }
  func.func @transform_5(%arg0: i32) -> (i32, i32) {
    %c0_i32 = arith.constant 0 : i32
    %c0_i32_0 = arith.constant 0 : i32
    %c0_i32_1 = arith.constant 0 : i32
    return %c0_i32, %c0_i32_0 : i32, i32
  }
  func.func @transform_6(%arg0: i32) -> (i32, i32) {
    %c0_i32 = arith.constant 0 : i32
    %c0_i32_0 = arith.constant 0 : i32
    %c0_i32_1 = arith.constant 0 : i32
    return %c0_i32, %c0_i32_0 : i32, i32
  }
  func.func @transform_7(%arg0: i32) -> (i32, i32) {
    %c0_i32 = arith.constant 0 : i32
    %c0_i32_0 = arith.constant 0 : i32
    return %arg0, %c0_i32 : i32, i32
  }
}

</mosaic_0001>

<bundles_post_ra>
// kernel: forward_model.1
= control target key start
LH: loop header
LB: loop body
LE: loop exit
PB: predicated region body
PF: predicated region fallthrough
CT: control target
= control target key end

     0   :  { %12 = vsyncpa [#allocation3], 0  ;;  %s700_s0 = inlined_call_operand.vmem [shape: f32[8,16], index: 0, kind: input, shape index: {}]   ;;  %s701_s1 = inlined_call_operand.hbm [shape: f32[16,128], index: 1, kind: input, shape index: {}]   ;;  %s702_s2 = inlined_call_operand.vmem [shape: f32[1,128], index: 2, kind: input, shape index: {}]   ;;  %s703_s3 = inlined_call_operand.vmem [shape: f32[128,128], index: 3, kind: input, shape index: {}]   ;;  %s704_s4 = inlined_call_operand.vmem [shape: f32[1,128], index: 4, kind: input, shape index: {}]   ;;  %s705_s5 = inlined_call_operand.vmem [shape: f32[128,4], index: 5, kind: input, shape index: {}]   ;;  %s706_s6 = inlined_call_operand.hbm [shape: f32[1,4], index: 6, kind: input, shape index: {}]   ;;  %s707_s7 = inlined_call_operand.vmem [shape: f32[8,4], index: 7, kind: output, shape index: {}]  }
   0x1   :  { %13 = vsyncpa [#allocation5], 0  ;;  %s500_s24 = smov [#allocation2]  }
   0x2   :  { %s21_s25 = sshll.u32 %s500_s24, 4  ;;  %s22_s25 = int_to_ptr.vmem [resolvable:$true] %s21_s25 }
   0x3   :  { %s464_s26 = scalar_lea.vmem %s22_s25, 256  ;;  %p469_p1 = scmp.lt.s32.totalorder %s22_s25, %s22_s25 }
   0x4   :  { %p465_p0 = scmp.ne.s32.totalorder %s22_s25, %s464_s26  ;;  %p470_p2 = scmp.lt.s32.totalorder %s464_s26, %s464_s26 }
   0x6   :  { %p471_p3 = por %p470_p2, %p469_p1 }
   0x8   :  { %p472_p4 = pnand %p471_p3, %p465_p0 }
   0xa   :  { %475 = shalt.err (!%p472_p4)
}
   0xb   :  { %s501_s27 = smov 128   ;;  %s502_s28 = smov 8  }
   0xc   :  { %27 = dma.hbm_to_vmem [thread:$0]  %s701_s1, 256, %s22_s25, [#allocation3], %s501_s27, %s501_s27, %s502_s28  }
   0xd   :  { %s503_s8 = smov [#allocation4]  }
   0xe   :  { %s42_s9 = sshll.u32 %s503_s8, 4  ;;  %s43_s9 = int_to_ptr.vmem [resolvable:$true] %s42_s9 }
   0xf   :  { %s484_s10 = scalar_lea.vmem %s43_s9, 16  ;;  %s488_s11 = scalar_lea.vmem %s43_s9, 32 }
  0x10   :  { %p485_p5 = scmp.ne.s32.totalorder %s43_s9, %s484_s10  ;;  %p489_p6 = scmp.lt.s32.totalorder %s43_s9, %s43_s9 }
  0x11   :  { %p490_p7 = scmp.lt.s32.totalorder %s488_s11, %s484_s10 }
  0x13   :  { %p491_p8 = por %p490_p7, %p489_p6 }
  0x15   :  { %p492_p9 = pnand %p491_p8, %p485_p5 }
  0x17   :  { %495 = shalt.err (!%p492_p9)
}
  0x18   :  { %45 = dma.hbm_to_vmem [thread:$0]  %s706_s6, 16, %s43_s9, [#allocation5]  }
  0x19   :  { %496 = dma.done.wait [#allocation3], 256  }
  0x1a   :  { %497 = vsyncadd [#allocation3], 4294967040 }
  0x1b   :  { %498 = dma.done.wait [#allocation5], 16  }
  0x1c   :  { %499 = vsyncadd [#allocation5], 4294967280  ;;  %v504_v0 = vmov 0.0   ;;  %vm505_vm0 = vmmov 0   ;;  %v54_v1 = vld [vmem:[#allocation2 + $0x8] sm:$0xff]  ;;  %v53_v2 = vld [vmem:[#allocation2] sm:$0xff] }
  0x1d   :  { %373 = vmatprep.subr.mxu0 %v504_v0  ;;  %377 = vmatprep.mubr.msk.f32.mxu0 %vm505_vm0, %v504_v0  ;;  %v52_v3 = vld [vmem:[%s700_s0] sm:$0xff]  ;;  %vm62_vm1 = vcmask 130048   ;;  %v152_v4 = vld [vmem:[%s703_s3 + $0x78] sm:$0xff]  ;;  %v151_v5 = vld [vmem:[%s703_s3 + $0x70] sm:$0xff]  ;;  %vm324_vm2 = vcmask 31744  }
  0x1e   :  { %380 = vmatprep.subr.mxu1 %v504_v0  ;;  %412 = vmatprep.mubr.msk.f32.mxu1 %vm505_vm0, %v504_v0  ;;  %v150_v6 = vld [vmem:[%s703_s3 + $0x68] sm:$0xff]  ;;  %v149_v7 = vld [vmem:[%s703_s3 + $0x60] sm:$0xff]  ;;  %v148_v8 = vld [vmem:[%s703_s3 + $0x58] sm:$0xff] }
  0x1f   :  { %374 = vmatpush3.msra.mxu0 %v54_v1  ;;  %381 = vmatpush3.msra.mxu1 %v152_v4  ;;  %v147_v9 = vld [vmem:[%s703_s3 + $0x50] sm:$0xff]  ;;  %v146_v10 = vld [vmem:[%s703_s3 + $0x48] sm:$0xff]  ;;  %v145_v11 = vld [vmem:[%s703_s3 + $0x40] sm:$0xff] }
  0x20   :  { %375 = vmatprep.subr.mxu0 %v504_v0  ;;  %382 = vmatprep.subr.mxu1 %v504_v0  ;;  %v144_v12 = vld [vmem:[%s703_s3 + $0x38] sm:$0xff]  ;;  %v143_v13 = vld [vmem:[%s703_s3 + $0x30] sm:$0xff]  ;;  %v142_v14 = vld [vmem:[%s703_s3 + $0x28] sm:$0xff] }
  0x21   :  { %376 = vmatpush3.msra.mxu0 %v53_v2  ;;  %383 = vmatpush3.msra.mxu1 %v151_v5  ;;  %v141_v15 = vld [vmem:[%s703_s3 + $0x20] sm:$0xff]  ;;  %v140_v16 = vld [vmem:[%s703_s3 + $0x18] sm:$0xff]  ;;  %v139_v17 = vld [vmem:[%s703_s3 + $0x10] sm:$0xff] }
  0x22   :  { %378 = vmatmul.mubr.msk.f32.vlgmr.msra.gmra.mxu0 %vm62_vm1, %v52_v3  ;;  %384 = vmatprep.subr.mxu1 %v504_v0  ;;  %v138_v18 = vld [vmem:[%s703_s3 + $0x8] sm:$0xff]  ;;  %v137_v19 = vld [vmem:[%s703_s3] sm:$0xff]  ;;  %v246_v20 = vld [vmem:[%s705_s5 + $0x78] sm:$0xff] }
  0x23   :  { %415 = vmatprep.subr.mxu0 %v504_v0  ;;  %385 = vmatpush3.msra.mxu1 %v150_v6  ;;  %v245_v21 = vld [vmem:[%s705_s5 + $0x70] sm:$0xff]  ;;  %v244_v22 = vld [vmem:[%s705_s5 + $0x68] sm:$0xff]  ;;  %v243_v23 = vld [vmem:[%s705_s5 + $0x60] sm:$0xff] }
  0x24   :  { %447 = vmatprep.mubr.msk.f32.mxu0 %vm505_vm0, %v504_v0  ;;  %386 = vmatprep.subr.mxu1 %v504_v0  ;;  %v242_v24 = vld [vmem:[%s705_s5 + $0x58] sm:$0xff]  ;;  %v241_v25 = vld [vmem:[%s705_s5 + $0x50] sm:$0xff]  ;;  %v240_v26 = vld [vmem:[%s705_s5 + $0x48] sm:$0xff] }
  0x25   :  { %387 = vmatpush3.msra.mxu1 %v149_v7  ;;  %416 = vmatpush3.msra.mxu0 %v246_v20  ;;  %v239_v27 = vld [vmem:[%s705_s5 + $0x40] sm:$0xff]  ;;  %v238_v28 = vld [vmem:[%s705_s5 + $0x38] sm:$0xff]  ;;  %v237_v29 = vld [vmem:[%s705_s5 + $0x30] sm:$0xff] }
  0x26   :  { %388 = vmatprep.subr.mxu1 %v504_v0  ;;  %417 = vmatprep.subr.mxu0 %v504_v0  ;;  %v236_v30 = vld [vmem:[%s705_s5 + $0x28] sm:$0xff]  ;;  %v235_v31 = vld [vmem:[%s705_s5 + $0x20] sm:$0xff]  ;;  %v234_v32 = vld [vmem:[%s705_s5 + $0x18] sm:$0xff] }
  0x27   :  { %389 = vmatpush3.msra.mxu1 %v148_v8  ;;  %418 = vmatpush3.msra.mxu0 %v245_v21  ;;  %v332_v33 = vld [vmem:[%s702_s2] ss:$0 sm:$0xff]  ;;  %v233_v38 = vld [vmem:[%s705_s5 + $0x10] sm:$0xff]  ;;  %v232_v39 = vld [vmem:[%s705_s5 + $0x8] sm:$0xff] }
  0x28   :  { %390 = vmatprep.subr.mxu1 %v504_v0  ;;  %419 = vmatprep.subr.mxu0 %v504_v0  ;;  %v231_v40 = vld [vmem:[%s705_s5] sm:$0xff]  ;;  %v335_v46 = vld [vmem:[#allocation4] ss:$0 sm:$0xff] }
  0x29   :  { %391 = vmatpush3.msra.mxu1 %v147_v9  ;;  %420 = vmatpush3.msra.mxu0 %v244_v22  ;;  %v334_v41 = vld [vmem:[%s704_s4] ss:$0 sm:$0xff] }
  0x2a   :  { %392 = vmatprep.subr.mxu1 %v504_v0  ;;  %421 = vmatprep.subr.mxu0 %v504_v0 }
  0x2b   :  { %393 = vmatpush3.msra.mxu1 %v146_v10  ;;  %422 = vmatpush3.msra.mxu0 %v243_v23 }
  0x2c   :  { %394 = vmatprep.subr.mxu1 %v504_v0  ;;  %423 = vmatprep.subr.mxu0 %v504_v0 }
  0x2d   :  { %395 = vmatpush3.msra.mxu1 %v145_v11  ;;  %424 = vmatpush3.msra.mxu0 %v242_v24 }
  0x2e   :  { %396 = vmatprep.subr.mxu1 %v504_v0  ;;  %425 = vmatprep.subr.mxu0 %v504_v0 }
  0x2f   :  { %397 = vmatpush3.msra.mxu1 %v144_v12  ;;  %426 = vmatpush3.msra.mxu0 %v241_v25 }
  0x30   :  { %398 = vmatprep.subr.mxu1 %v504_v0  ;;  %427 = vmatprep.subr.mxu0 %v504_v0 }
  0x31   :  { %399 = vmatpush3.msra.mxu1 %v143_v13  ;;  %428 = vmatpush3.msra.mxu0 %v240_v26 }
  0x32   :  { %400 = vmatprep.subr.mxu1 %v504_v0  ;;  %429 = vmatprep.subr.mxu0 %v504_v0 }
  0x33   :  { %401 = vmatpush3.msra.mxu1 %v142_v14  ;;  %430 = vmatpush3.msra.mxu0 %v239_v27 }
  0x34   :  { %402 = vmatprep.subr.mxu1 %v504_v0  ;;  %431 = vmatprep.subr.mxu0 %v504_v0 }
  0x35   :  { %403 = vmatpush3.msra.mxu1 %v141_v15  ;;  %432 = vmatpush3.msra.mxu0 %v238_v28 }
  0x36   :  { %404 = vmatprep.subr.mxu1 %v504_v0  ;;  %433 = vmatprep.subr.mxu0 %v504_v0 }
  0x37   :  { %405 = vmatpush3.msra.mxu1 %v140_v16  ;;  %434 = vmatpush3.msra.mxu0 %v237_v29 }
  0x38   :  { %406 = vmatprep.subr.mxu1 %v504_v0  ;;  %435 = vmatprep.subr.mxu0 %v504_v0 }
  0x39   :  { %407 = vmatpush3.msra.mxu1 %v139_v17  ;;  %436 = vmatpush3.msra.mxu0 %v236_v30 }
  0x3a   :  { %408 = vmatprep.subr.mxu1 %v504_v0  ;;  %437 = vmatprep.subr.mxu0 %v504_v0 }
  0x3b   :  { %409 = vmatpush3.msra.mxu1 %v138_v18  ;;  %438 = vmatpush3.msra.mxu0 %v235_v31 }
  0x3c   :  { %410 = vmatprep.subr.mxu1 %v504_v0  ;;  %439 = vmatprep.subr.mxu0 %v504_v0 }
  0x3d   :  { %411 = vmatpush3.msra.mxu1 %v137_v19  ;;  %440 = vmatpush3.msra.mxu0 %v234_v32 }
  0x3e   :  { %441 = vmatprep.subr.mxu0 %v504_v0 }
  0x3f   :  { %442 = vmatpush3.msra.mxu0 %v233_v38 }
  0x40   :  { %443 = vmatprep.subr.mxu0 %v504_v0 }
  0x41   :  { %444 = vmatpush3.msra.mxu0 %v232_v39 }
  0x42   :  { %445 = vmatprep.subr.mxu0 %v504_v0 }
  0x43   :  { %446 = vmatpush3.msra.mxu0 %v231_v40 }
  0xe2   :  { %v132_v34 = vpop.f32.mrf.mxu0 }
  0xe3   :  { %v133_v35 = vadd.f32 %v332_v33, %v132_v34 }
  0xe4   :  { %v379_v36 = vpop.f32.mrf.mxu0 }
  0xe5   :  { %v136_v37 = vmax.f32 %v133_v35, 0.0 }
  0xe7   :  { %413 = vmatmul.mubr.f32.vlgmr.msra.gmra.mxu1 %v136_v37 }
 0x1a7   :  { %v226_v42 = vpop.f32.mrf.mxu1 }
 0x1a8   :  { %v227_v43 = vadd.f32 %v334_v41, %v226_v42 }
 0x1a9   :  { %v414_v44 = vpop.f32.mrf.mxu1 }
 0x1aa   :  { %v230_v45 = vmax.f32 %v227_v43, 0.0 }
 0x1ac   :  { %448 = vmatmul.mubr.f32.vlgmr.msra.gmra.mxu0 %v230_v45 }
 0x26c   :  { %v320_v47 = vpop.f32.mrf.mxu0 }
 0x26d   :  { %v321_v48 = vadd.f32 %v335_v46, %v320_v47 }
 0x26e   :  { %v449_v49 = vpop.f32.mrf.mxu0 }
 0x26f   :  { %325 = vst.msk [vmem:[%s707_s7] sm:$0xff] %vm324_vm2, %v321_v48 }
 0x270   :  { %330 = vsyncpa [#allocation3], 1 }
 0x271   :  { %331 = vsyncpa [#allocation5], 1 }

</bundles_post_ra>
